<compile_context>
chip_gen: v6e
topology: v6e:2x2x1
jax: 0.10.0
libtpu: 0.0.40
codegen_flags: <defaults>
</compile_context>

<pallas_src>
import functools

import jax
import jax.numpy as jnp
from jax import lax
from jax.experimental import pallas as pl
from jax.experimental.pallas import tpu as pltpu


def _round_up(x, m):
    return (x + m - 1) // m * m


def _plan_tiles(Lp, H, hs, NH):
    """Pick query-tile TQ, vmem_limit_bytes and the x-block buffer count.

    Budgets against the *actual* generation's VMEM (64 MiB on v7x, 128 MiB on
    v5e/v6e); the double-buffered (1, NH, TQ, Lp) output block dominates.
    """
    try:
        phys = int(pltpu.get_tpu_info().vmem_capacity_bytes)
    except Exception:  # no TPU info available -> assume the smallest part (v7x)
        phys = 64 << 20
    budget = (phys * 3) // 4                      # 48 MiB on v7x, 96 MiB on v5e/v6e

    f4 = 4  # float32 bytes
    params = f4 * 2 * (H * 2 * hs + 2 * hs + hs            # wd, bd, sq
                       + NH * 2 * hs + NH                   # wh_even_t, bh_even
                       + 2 * hs * NH + NH)                  # wh_odd, bh_odd
    scratch = f4 * (Lp * hs + hs * Lp                       # q_all, v_t
                    + _round_up(NH, 8) * Lp                 # be_t
                    + Lp * _round_up(NH, 128))              # bo_all (lane padded)
    h_tmp = f4 * Lp * 2 * hs                                # h_all temporary (qt==0)
    mask_b = f4 * 2 * _round_up(Lp, 128)

    # Single-buffer the x block only when its double-buffered copy alone would
    # eat >25% of the budget (huge L*H on the 64 MiB part); losing one x DMA of
    # prefetch per batch is negligible vs NH*L*L output writes.
    x_bufs = 1 if 2 * f4 * Lp * H > budget // 4 else 2
    fixed = x_bufs * f4 * Lp * H + params + scratch + h_tmp + mask_b

    tq = Lp  # fallback: single query tile
    for cand in (1024, 512, 256, 128, 64, 32, 16, 8):
        if Lp % cand == 0:
            tq = cand
            per_tile = 2 * f4 * NH * cand * Lp + 4 * f4 * cand * Lp
            if fixed + per_tile <= budget:
                break

    need = fixed + 2 * f4 * NH * tq * Lp + 4 * f4 * tq * Lp + (4 << 20)
    vmem_limit = int(min(max(need, 32 << 20), phys - (8 << 20)))
    return tq, vmem_limit, x_bufs


def _egp_kernel(x_ref, mask_ref, wd_ref, bd_ref, sq_ref, whe_ref, bhe_ref,
                who_ref, bho_ref, out_ref,
                q_all, v_t, be_t, bo_all,
                *, num_heads, head_size, block_q):
    NH, hs, TQ = num_heads, head_size, block_q
    Lp = x_ref.shape[1]
    qt = pl.program_id(1)

    # ---- once per batch: key-side work, hoisted across all query tiles ------
    @pl.when(qt == 0)
    def _():
        x_all = x_ref[0]                                                 # [Lp, H]
        h_all = jnp.dot(x_all, wd_ref[...],
                        preferred_element_type=jnp.float32) + bd_ref[...]  # [Lp, 2hs]
        # q side: rope (per-channel), v-side rope and 1/sqrt(hs) all folded
        # into one per-channel scale in the wrapper.
        q_all[...] = h_all[:, :hs] * sq_ref[...]                         # [Lp, hs]
        # v side pre-transposed once so the per-tile scores matmul is plain NN.
        v_t[...] = jnp.transpose(h_all[:, hs:])                          # [hs, Lp]
        # even-head (per-key) bias directly in [NH, Lp] layout (NT matmul; the
        # 0.5 is folded into the weights/bias in the wrapper).
        be_t[...] = lax.dot_general(whe_ref[...], h_all,
                                    (((1,), (1,)), ((), ())),
                                    preferred_element_type=jnp.float32) + bhe_ref[...]
        # odd-head (per-query) bias for all query rows.
        bo_all[...] = jnp.dot(h_all, who_ref[...],
                              preferred_element_type=jnp.float32) + bho_ref[...]

    # ---- per query tile ------------------------------------------------------
    row0 = pl.multiple_of(qt * TQ, TQ)
    q = q_all[pl.ds(row0, TQ), :]                                        # [TQ, hs]
    scores = jnp.dot(q, v_t[...], preferred_element_type=jnp.float32)    # [TQ, Lp]
    bo = bo_all[pl.ds(row0, TQ), :]                                      # [TQ, NH]

    # mask: keep strictly-upper-triangular & non-pad keys, add -1e12 elsewhere
    rows = lax.broadcasted_iota(jnp.int32, (TQ, Lp), 0) + row0
    cols = lax.broadcasted_iota(jnp.int32, (TQ, Lp), 1)
    valid = jnp.logical_and(cols > rows, mask_ref[0] > 0.0)              # [TQ, Lp]
    base = scores + jnp.where(valid, jnp.float32(0.0), jnp.float32(-1e12))

    # one lane-dense [TQ, Lp] store per head (NH is small - entity types)
    for hd in range(NH):
        out_ref[0, hd, :, :] = (base
                                + bo[:, hd:hd + 1]
                                + be_t[hd:hd + 1, :]).astype(out_ref.dtype)


def efficient_global_pointer(x, attention_mask, wd, bd, wh, bh,
                             *, num_heads, head_size, if_rope=True):
    """x: [B, L, H]; attention_mask: [B, L]; wd: [H, 2*hs]; bd: [2*hs];
    wh: [2*hs, 2*num_heads]; bh: [2*num_heads].  Returns [B, num_heads, L, L]."""
    B, L, H = x.shape
    hs, NH = head_size, num_heads

    # pad the sequence so output stores are lane/sublane friendly
    Lp = _round_up(L, 128) if L >= 128 else _round_up(L, 8)
    if Lp != L:
        x = jnp.pad(x, ((0, 0), (0, Lp - L), (0, 0)))
        attention_mask = jnp.pad(attention_mask, ((0, 0), (0, Lp - L)))

    TQ, vmem_limit, x_bufs = _plan_tiles(Lp, H, hs, NH)
    QT = Lp // TQ

    # ---- plain-JAX parameter glue -------------------------------------------
    bd2 = bd.reshape(1, 2 * hs)
    # the module's RoPE has no position ids -> exact per-channel scale
    if if_rope:
        idx = jnp.arange(hs // 2, dtype=jnp.float32)
        inv = jnp.power(jnp.float32(10000.0), -2.0 * idx / hs)
        trans = jnp.tile(jnp.array([-1.0, 1.0], jnp.float32), hs // 2)
        rope_scale = jnp.repeat(jnp.cos(inv), 2) + trans * jnp.repeat(jnp.sin(inv), 2)
    else:
        rope_scale = jnp.ones((hs,), jnp.float32)
    # scores = sum_c (q*s)(v*s) = sum_c q*v*s^2  -> fold both scales and the
    # 1/sqrt(hs) onto the q side only.
    sq = (rope_scale * rope_scale / jnp.sqrt(jnp.float32(hs))).reshape(1, hs)
    # head-bias params: even output channels -> per-key bias, odd -> per-query;
    # the /2 is folded into weights and biases.
    whe_t = jnp.transpose(wh[:, 0::2]) * 0.5                 # [NH, 2hs]
    bhe_col = (bh[0::2] * 0.5).reshape(NH, 1)                # [NH, 1]
    who = wh[:, 1::2] * 0.5                                  # [2hs, NH]
    bho_row = (bh[1::2] * 0.5).reshape(1, NH)                # [1, NH]
    mask3 = attention_mask.astype(jnp.float32).reshape(B, 1, Lp)

    kernel = functools.partial(_egp_kernel, num_heads=NH, head_size=hs, block_q=TQ)

    def _const(shape):
        return pl.BlockSpec(shape, lambda b, qt: (0,) * len(shape))

    if x_bufs == 1:
        x_spec = pl.BlockSpec((1, Lp, H), lambda b, qt: (b, 0, 0),
                              pipeline_mode=pl.Buffered(1))
    else:
        x_spec = pl.BlockSpec((1, Lp, H), lambda b, qt: (b, 0, 0))

    grid_spec = pltpu.PrefetchScalarGridSpec(
        num_scalar_prefetch=0,
        grid=(B, QT),
        in_specs=[
            x_spec,                                              # x (resident across qt)
            pl.BlockSpec((1, 1, Lp), lambda b, qt: (b, 0, 0)),   # key padding mask
            _const((H, 2 * hs)), _const((1, 2 * hs)),            # wd, bd
            _const((1, hs)),                                     # folded q scale
            _const((NH, 2 * hs)), _const((NH, 1)),               # wh_even_t, bh_even
            _const((2 * hs, NH)), _const((1, NH)),               # wh_odd, bh_odd
        ],
        out_specs=pl.BlockSpec((1, NH, TQ, Lp), lambda b, qt: (b, 0, qt, 0)),
        scratch_shapes=[
            pltpu.VMEM((Lp, hs), jnp.float32),     # q_all (scaled)
            pltpu.VMEM((hs, Lp), jnp.float32),     # v_t (pre-transposed)
            pltpu.VMEM((NH, Lp), jnp.float32),     # per-key even-head bias
            pltpu.VMEM((Lp, NH), jnp.float32),     # per-query odd-head bias
        ],
    )

    cost = pl.CostEstimate(
        flops=2 * B * (Lp * H * 2 * hs + Lp * 2 * hs * 2 * NH + Lp * Lp * hs),
        transcendentals=0,
        bytes_accessed=4 * (B * NH * Lp * Lp + B * Lp * H + B * Lp
                            + H * 2 * hs + 2 * hs * 2 * NH + 2 * hs + 2 * NH),
    )

    out = pl.pallas_call(
        kernel,
        out_shape=jax.ShapeDtypeStruct((B, NH, Lp, Lp), jnp.float32),
        grid_spec=grid_spec,
        cost_estimate=cost,
        compiler_params=pltpu.CompilerParams(
            # qt must be "arbitrary": key-side scratch is filled at qt == 0 and
            # reused by later qt iterations of the same batch.
            dimension_semantics=("parallel", "arbitrary"),
            vmem_limit_bytes=vmem_limit),
    )(x, mask3, wd, bd2, sq, whe_t, bhe_col, who, bho_row)

    if Lp != L:
        out = out[:, :, :L, :L]
    return out


def _reference(x, attention_mask, wd, bd, wh, bh, *, num_heads, head_size, if_rope):
    """Pure-JAX mirror of the PyTorch forward, for verification."""
    hs = head_size
    h = x @ wd + bd
    q, v = h[..., :hs], h[..., hs:]
    if if_rope:
        idx = jnp.arange(hs // 2, dtype=jnp.float32)
        inv = jnp.power(jnp.float32(10000.0), -2.0 * idx / hs)
        cos = jnp.repeat(jnp.cos(inv), 2)
        sin = jnp.repeat(jnp.sin(inv), 2)
        trans = jnp.tile(jnp.array([-1.0, 1.0], jnp.float32), hs // 2)
        q = q * cos + q * trans * sin
        v = v * cos + v * trans * sin
    scores = jnp.einsum('bid,bjd->bij', q, v) / jnp.sqrt(jnp.float32(hs))
    bias = jnp.transpose(h @ wh + bh, (0, 2, 1)) / 2.0                  # [B, 2*NH, L]
    scores = scores[:, None] + bias[:, 0::2, None] + bias[:, 1::2, :, None]
    L = scores.shape[-1]
    att = attention_mask[:, None, None, :]
    low_tri = 1.0 - jnp.tril(jnp.ones((L, L), jnp.float32))
    m = jnp.maximum(att + low_tri - 1.0, 0.0)
    return scores + (1.0 - m) * (-1000000000000.0)


if __name__ == "__main__":
    B, L, H = 2, 8, 32          # batch, seq, hidden_size
    NH, HS = 4, 16              # num_heads (entity types), head_size

    key = jax.random.PRNGKey(0)
    k1, k2, k3, k4, k5 = jax.random.split(key, 5)

    x = jax.random.normal(k1, (B, L, H), dtype=jnp.float32)
    lens = jnp.array([8, 5])
    attention_mask = (jnp.arange(L)[None, :] < lens[:, None]).astype(jnp.float32)

    # Deterministic synthetic parameters (nn.Linear shapes, stored as [in, out]).
    wd = jax.random.normal(k2, (H, 2 * HS), dtype=jnp.float32) * 0.05
    bd = jax.random.normal(k3, (2 * HS,), dtype=jnp.float32) * 0.05
    wh = jax.random.normal(k4, (2 * HS, 2 * NH), dtype=jnp.float32) * 0.05
    bh = jax.random.normal(k5, (2 * NH,), dtype=jnp.float32) * 0.05

    for rope_flag in (True, False):
        out = efficient_global_pointer(x, attention_mask, wd, bd, wh, bh,
                                       num_heads=NH, head_size=HS, if_rope=rope_flag)
        out = jax.block_until_ready(out)
        ref = _reference(x, attention_mask, wd, bd, wh, bh,
                         num_heads=NH, head_size=HS, if_rope=rope_flag)
        assert out.shape == (B, NH, L, L), out.shape
        assert jnp.allclose(out, ref, rtol=1e-3, atol=1e-3), \
            f"if_rope={rope_flag}: max abs diff {jnp.max(jnp.abs(out - ref))}"

    print("KERNEL_OK")
</pallas_src>

<mosaic_0001>
module attributes {stable_mosaic.version = 11 : i64} {
  func.func @_egp_kernel(%arg0: i32, %arg1: i32, %arg2: memref<1x8x32xf32, #tpu.memory_space<vmem>>, %arg3: memref<1x1x8xf32, #tpu.memory_space<vmem>>, %arg4: memref<32x32xf32, #tpu.memory_space<vmem>>, %arg5: memref<1x32xf32, #tpu.memory_space<vmem>>, %arg6: memref<1x16xf32, #tpu.memory_space<vmem>>, %arg7: memref<4x32xf32, #tpu.memory_space<vmem>>, %arg8: memref<4x1xf32, #tpu.memory_space<vmem>>, %arg9: memref<32x4xf32, #tpu.memory_space<vmem>>, %arg10: memref<1x4xf32, #tpu.memory_space<vmem>>, %arg11: memref<1x4x8x8xf32, #tpu.memory_space<vmem>>, %arg12: memref<8x16xf32, #tpu.memory_space<vmem>>, %arg13: memref<16x8xf32, #tpu.memory_space<vmem>>, %arg14: memref<4x8xf32, #tpu.memory_space<vmem>>, %arg15: memref<8x4xf32, #tpu.memory_space<vmem>>) attributes {dimension_semantics = [#tpu.dimension_semantics<parallel>, #tpu.dimension_semantics<arbitrary>], iteration_bounds = array<i64: 2, 1>, scalar_prefetch = 0 : i64, scratch_operands = 4 : i64, tpu.core_type = #tpu.core_type<tc>, window_params = [{transform_indices = @transform_0, window_bounds = array<i64: 1, 8, 32>}, {transform_indices = @transform_1, window_bounds = array<i64: 1, 1, 8>}, {pipeline_mode = #tpu.pipeline_mode<synchronous>, transform_indices = @transform_2, window_bounds = array<i64: 32, 32>}, {pipeline_mode = #tpu.pipeline_mode<synchronous>, transform_indices = @transform_3, window_bounds = array<i64: 1, 32>}, {pipeline_mode = #tpu.pipeline_mode<synchronous>, transform_indices = @transform_4, window_bounds = array<i64: 1, 16>}, {pipeline_mode = #tpu.pipeline_mode<synchronous>, transform_indices = @transform_5, window_bounds = array<i64: 4, 32>}, {pipeline_mode = #tpu.pipeline_mode<synchronous>, transform_indices = @transform_6, window_bounds = array<i64: 4, 1>}, {pipeline_mode = #tpu.pipeline_mode<synchronous>, transform_indices = @transform_7, window_bounds = array<i64: 32, 4>}, {pipeline_mode = #tpu.pipeline_mode<synchronous>, transform_indices = @transform_8, window_bounds = array<i64: 1, 4>}, {transform_indices = @transform_9, window_bounds = array<i64: 1, 4, 8, 8>}]} {
    %c0_i32 = arith.constant 0 : i32
    %0 = arith.cmpi eq, %arg1, %c0_i32 : i32
    %1 = arith.extui %0 : i1 to i32
    %c0_i32_0 = arith.constant 0 : i32
    %2 = arith.cmpi ne, %1, %c0_i32_0 : i32
    scf.if %2 {
      %c0_31 = arith.constant 0 : index
      %c0_32 = arith.constant 0 : index
      %c0_33 = arith.constant 0 : index
      %62 = vector.load %arg2[%c0_31, %c0_32, %c0_33] : memref<1x8x32xf32, #tpu.memory_space<vmem>>, vector<1x8x32xf32>
      %63 = vector.shape_cast %62 : vector<1x8x32xf32> to vector<8x32xf32>
      %c0_34 = arith.constant 0 : index
      %c0_35 = arith.constant 0 : index
      %64 = vector.load %arg4[%c0_34, %c0_35] : memref<32x32xf32, #tpu.memory_space<vmem>>, vector<32x32xf32>
      %cst_36 = arith.constant dense<0.000000e+00> : vector<8x32xf32>
      %65 = tpu.matmul %63, %64, %cst_36 {dimension_numbers = #tpu.dot_dimension_numbers<[1], [0], [0], [1], [0, 0, 1, 1], [], []>} : vector<8x32xf32>, vector<32x32xf32>, vector<8x32xf32> -> vector<8x32xf32>
      %c0_37 = arith.constant 0 : index
      %c0_38 = arith.constant 0 : index
      %66 = vector.load %arg5[%c0_37, %c0_38] : memref<1x32xf32, #tpu.memory_space<vmem>>, vector<1x32xf32>
      %67 = vector.broadcast %66 : vector<1x32xf32> to vector<8x32xf32>
      %68 = arith.addf %65, %67 : vector<8x32xf32>
      %69 = vector.extract_strided_slice %68 {offsets = [0, 0], sizes = [8, 16], strides = [1, 1]} : vector<8x32xf32> to vector<8x16xf32>
      %c0_39 = arith.constant 0 : index
      %c0_40 = arith.constant 0 : index
      %70 = vector.load %arg6[%c0_39, %c0_40] : memref<1x16xf32, #tpu.memory_space<vmem>>, vector<1x16xf32>
      %71 = vector.broadcast %70 : vector<1x16xf32> to vector<8x16xf32>
      %72 = arith.mulf %69, %71 : vector<8x16xf32>
      %c0_41 = arith.constant 0 : index
      %c0_42 = arith.constant 0 : index
      %73 = vector.load %arg12[%c0_41, %c0_42] : memref<8x16xf32, #tpu.memory_space<vmem>>, vector<8x16xf32>
      tpu.vector_store %arg12[%c0_41, %c0_42], %72 {strides = array<i32>} : memref<8x16xf32, #tpu.memory_space<vmem>>, vector<8x16xf32>,
      %74 = vector.extract_strided_slice %68 {offsets = [0, 16], sizes = [8, 16], strides = [1, 1]} : vector<8x32xf32> to vector<8x16xf32>
      %75 = tpu.transpose %74, [1, 0] : vector<8x16xf32> -> vector<16x8xf32>
      %c0_43 = arith.constant 0 : index
      %c0_44 = arith.constant 0 : index
      %76 = vector.load %arg13[%c0_43, %c0_44] : memref<16x8xf32, #tpu.memory_space<vmem>>, vector<16x8xf32>
      tpu.vector_store %arg13[%c0_43, %c0_44], %75 {strides = array<i32>} : memref<16x8xf32, #tpu.memory_space<vmem>>, vector<16x8xf32>,
      %c0_45 = arith.constant 0 : index
      %c0_46 = arith.constant 0 : index
      %77 = vector.load %arg7[%c0_45, %c0_46] : memref<4x32xf32, #tpu.memory_space<vmem>>, vector<4x32xf32>
      %cst_47 = arith.constant dense<0.000000e+00> : vector<4x8xf32>
      %78 = tpu.matmul %77, %68, %cst_47 {dimension_numbers = #tpu.dot_dimension_numbers<[1], [1], [0], [0], [0, 0, 1, 0], [], []>} : vector<4x32xf32>, vector<8x32xf32>, vector<4x8xf32> -> vector<4x8xf32>
      %c0_48 = arith.constant 0 : index
      %c0_49 = arith.constant 0 : index
      %79 = vector.load %arg8[%c0_48, %c0_49] : memref<4x1xf32, #tpu.memory_space<vmem>>, vector<4x1xf32>
      %80 = vector.broadcast %79 : vector<4x1xf32> to vector<4x8xf32>
      %81 = arith.addf %78, %80 : vector<4x8xf32>
      %c0_50 = arith.constant 0 : index
      %c0_51 = arith.constant 0 : index
      %82 = vector.load %arg14[%c0_50, %c0_51] : memref<4x8xf32, #tpu.memory_space<vmem>>, vector<4x8xf32>
      tpu.vector_store %arg14[%c0_50, %c0_51], %81 {strides = array<i32>} : memref<4x8xf32, #tpu.memory_space<vmem>>, vector<4x8xf32>,
      %c0_52 = arith.constant 0 : index
      %c0_53 = arith.constant 0 : index
      %83 = vector.load %arg9[%c0_52, %c0_53] : memref<32x4xf32, #tpu.memory_space<vmem>>, vector<32x4xf32>
      %cst_54 = arith.constant dense<0.000000e+00> : vector<8x4xf32>
      %84 = tpu.matmul %68, %83, %cst_54 {dimension_numbers = #tpu.dot_dimension_numbers<[1], [0], [0], [1], [0, 0, 1, 1], [], []>} : vector<8x32xf32>, vector<32x4xf32>, vector<8x4xf32> -> vector<8x4xf32>
      %c0_55 = arith.constant 0 : index
      %c0_56 = arith.constant 0 : index
      %85 = vector.load %arg10[%c0_55, %c0_56] : memref<1x4xf32, #tpu.memory_space<vmem>>, vector<1x4xf32>
      %86 = vector.broadcast %85 : vector<1x4xf32> to vector<8x4xf32>
      %87 = arith.addf %84, %86 : vector<8x4xf32>
      %c0_57 = arith.constant 0 : index
      %c0_58 = arith.constant 0 : index
      %88 = vector.load %arg15[%c0_57, %c0_58] : memref<8x4xf32, #tpu.memory_space<vmem>>, vector<8x4xf32>
      tpu.vector_store %arg15[%c0_57, %c0_58], %87 {strides = array<i32>} : memref<8x4xf32, #tpu.memory_space<vmem>>, vector<8x4xf32>,
    } else {
    }
    %c8_i32 = arith.constant 8 : i32
    %3 = arith.muli %arg1, %c8_i32 : i32
    %4 = tpu.assume_multiple %3, 8 : i32
    %5 = arith.index_cast %4 : i32 to index
    %c0 = arith.constant 0 : index
    %6 = vector.load %arg12[%5, %c0] : memref<8x16xf32, #tpu.memory_space<vmem>>, vector<8x16xf32>
    %c0_1 = arith.constant 0 : index
    %c0_2 = arith.constant 0 : index
    %7 = vector.load %arg13[%c0_1, %c0_2] : memref<16x8xf32, #tpu.memory_space<vmem>>, vector<16x8xf32>
    %cst = arith.constant dense<0.000000e+00> : vector<8x8xf32>
    %8 = tpu.matmul %6, %7, %cst {dimension_numbers = #tpu.dot_dimension_numbers<[1], [0], [0], [1], [0, 0, 1, 1], [], []>} : vector<8x16xf32>, vector<16x8xf32>, vector<8x8xf32> -> vector<8x8xf32>
    %9 = arith.index_cast %4 : i32 to index
    %c0_3 = arith.constant 0 : index
    %10 = vector.load %arg15[%9, %c0_3] : memref<8x4xf32, #tpu.memory_space<vmem>>, vector<8x4xf32>
    %11 = tpu.iota {dimensions = array<i32: 0>} : vector<8x8xi32>
    %12 = vector.broadcast %4 : i32 to vector<8x8xi32>
    %13 = arith.addi %11, %12 : vector<8x8xi32>
    %14 = tpu.iota {dimensions = array<i32: 1>} : vector<8x8xi32>
    %15 = arith.cmpi sgt, %14, %13 : vector<8x8xi32>
    %c0_4 = arith.constant 0 : index
    %c0_5 = arith.constant 0 : index
    %c0_6 = arith.constant 0 : index
    %16 = vector.load %arg3[%c0_4, %c0_5, %c0_6] : memref<1x1x8xf32, #tpu.memory_space<vmem>>, vector<1x1x8xf32>
    %17 = vector.shape_cast %16 : vector<1x1x8xf32> to vector<1x8xf32>
    %cst_7 = arith.constant 0.000000e+00 : f32
    %18 = vector.broadcast %cst_7 : f32 to vector<1x8xf32>
    %19 = arith.cmpf ogt, %17, %18 : vector<1x8xf32>
    %20 = vector.broadcast %19 : vector<1x8xi1> to vector<8x8xi1>
    %21 = arith.andi %15, %20 : vector<8x8xi1>
    %cst_8 = arith.constant 0.000000e+00 : f32
    %cst_9 = arith.constant -9.99999995E+11 : f32
    %22 = vector.broadcast %cst_8 : f32 to vector<8x8xf32>
    %23 = vector.broadcast %cst_9 : f32 to vector<8x8xf32>
    %24 = arith.select %21, %22, %23 : vector<8x8xi1>, vector<8x8xf32>
    %25 = arith.addf %8, %24 : vector<8x8xf32>
    %26 = vector.extract_strided_slice %10 {offsets = [0, 0], sizes = [8, 1], strides = [1, 1]} : vector<8x4xf32> to vector<8x1xf32>
    %27 = vector.broadcast %26 : vector<8x1xf32> to vector<8x8xf32>
    %28 = arith.addf %25, %27 : vector<8x8xf32>
    %c0_10 = arith.constant 0 : index
    %c0_11 = arith.constant 0 : index
    %29 = vector.load %arg14[%c0_10, %c0_11] : memref<4x8xf32, #tpu.memory_space<vmem>>, vector<1x8xf32>
    %30 = vector.broadcast %29 : vector<1x8xf32> to vector<8x8xf32>
    %31 = arith.addf %28, %30 : vector<8x8xf32>
    %c0_12 = arith.constant 0 : index
    %c0_13 = arith.constant 0 : index
    %c0_14 = arith.constant 0 : index
    %c0_15 = arith.constant 0 : index
    %32 = vector.load %arg11[%c0_12, %c0_13, %c0_14, %c0_15] : memref<1x4x8x8xf32, #tpu.memory_space<vmem>>, vector<1x1x8x8xf32>
    %33 = vector.shape_cast %32 : vector<1x1x8x8xf32> to vector<8x8xf32>
    %34 = vector.shape_cast %31 : vector<8x8xf32> to vector<1x1x8x8xf32>
    tpu.vector_store %arg11[%c0_12, %c0_13, %c0_14, %c0_15], %34 {strides = array<i32>} : memref<1x4x8x8xf32, #tpu.memory_space<vmem>>, vector<1x1x8x8xf32>,
    %35 = vector.extract_strided_slice %10 {offsets = [0, 1], sizes = [8, 1], strides = [1, 1]} : vector<8x4xf32> to vector<8x1xf32>
    %36 = vector.broadcast %35 : vector<8x1xf32> to vector<8x8xf32>
    %37 = arith.addf %25, %36 : vector<8x8xf32>
    %c1 = arith.constant 1 : index
    %c0_16 = arith.constant 0 : index
    %38 = vector.load %arg14[%c1, %c0_16] : memref<4x8xf32, #tpu.memory_space<vmem>>, vector<1x8xf32>
    %39 = vector.broadcast %38 : vector<1x8xf32> to vector<8x8xf32>
    %40 = arith.addf %37, %39 : vector<8x8xf32>
    %c0_17 = arith.constant 0 : index
    %c1_18 = arith.constant 1 : index
    %c0_19 = arith.constant 0 : index
    %c0_20 = arith.constant 0 : index
    %41 = vector.load %arg11[%c0_17, %c1_18, %c0_19, %c0_20] : memref<1x4x8x8xf32, #tpu.memory_space<vmem>>, vector<1x1x8x8xf32>
    %42 = vector.shape_cast %41 : vector<1x1x8x8xf32> to vector<8x8xf32>
    %43 = vector.shape_cast %40 : vector<8x8xf32> to vector<1x1x8x8xf32>
    tpu.vector_store %arg11[%c0_17, %c1_18, %c0_19, %c0_20], %43 {strides = array<i32>} : memref<1x4x8x8xf32, #tpu.memory_space<vmem>>, vector<1x1x8x8xf32>,
    %44 = vector.extract_strided_slice %10 {offsets = [0, 2], sizes = [8, 1], strides = [1, 1]} : vector<8x4xf32> to vector<8x1xf32>
    %45 = vector.broadcast %44 : vector<8x1xf32> to vector<8x8xf32>
    %46 = arith.addf %25, %45 : vector<8x8xf32>
    %c2 = arith.constant 2 : index
    %c0_21 = arith.constant 0 : index
    %47 = vector.load %arg14[%c2, %c0_21] : memref<4x8xf32, #tpu.memory_space<vmem>>, vector<1x8xf32>
    %48 = vector.broadcast %47 : vector<1x8xf32> to vector<8x8xf32>
    %49 = arith.addf %46, %48 : vector<8x8xf32>
    %c0_22 = arith.constant 0 : index
    %c2_23 = arith.constant 2 : index
    %c0_24 = arith.constant 0 : index
    %c0_25 = arith.constant 0 : index
    %50 = vector.load %arg11[%c0_22, %c2_23, %c0_24, %c0_25] : memref<1x4x8x8xf32, #tpu.memory_space<vmem>>, vector<1x1x8x8xf32>
    %51 = vector.shape_cast %50 : vector<1x1x8x8xf32> to vector<8x8xf32>
    %52 = vector.shape_cast %49 : vector<8x8xf32> to vector<1x1x8x8xf32>
    tpu.vector_store %arg11[%c0_22, %c2_23, %c0_24, %c0_25], %52 {strides = array<i32>} : memref<1x4x8x8xf32, #tpu.memory_space<vmem>>, vector<1x1x8x8xf32>,
    %53 = vector.extract_strided_slice %10 {offsets = [0, 3], sizes = [8, 1], strides = [1, 1]} : vector<8x4xf32> to vector<8x1xf32>
    %54 = vector.broadcast %53 : vector<8x1xf32> to vector<8x8xf32>
    %55 = arith.addf %25, %54 : vector<8x8xf32>
    %c3 = arith.constant 3 : index
    %c0_26 = arith.constant 0 : index
    %56 = vector.load %arg14[%c3, %c0_26] : memref<4x8xf32, #tpu.memory_space<vmem>>, vector<1x8xf32>
    %57 = vector.broadcast %56 : vector<1x8xf32> to vector<8x8xf32>
    %58 = arith.addf %55, %57 : vector<8x8xf32>
    %c0_27 = arith.constant 0 : index
    %c3_28 = arith.constant 3 : index
    %c0_29 = arith.constant 0 : index
    %c0_30 = arith.constant 0 : index
    %59 = vector.load %arg11[%c0_27, %c3_28, %c0_29, %c0_30] : memref<1x4x8x8xf32, #tpu.memory_space<vmem>>, vector<1x1x8x8xf32>
    %60 = vector.shape_cast %59 : vector<1x1x8x8xf32> to vector<8x8xf32>
    %61 = vector.shape_cast %58 : vector<8x8xf32> to vector<1x1x8x8xf32>
    tpu.vector_store %arg11[%c0_27, %c3_28, %c0_29, %c0_30], %61 {strides = array<i32>} : memref<1x4x8x8xf32, #tpu.memory_space<vmem>>, vector<1x1x8x8xf32>,
    return
  }
  func.func @transform_0(%arg0: i32, %arg1: i32) -> (i32, i32, i32) {
    %c0_i32 = arith.constant 0 : i32
    %c0_i32_0 = arith.constant 0 : i32
    %c0_i32_1 = arith.constant 0 : i32
    return %arg0, %c0_i32, %c0_i32_0 : i32, i32, i32
  }
  func.func @transform_1(%arg0: i32, %arg1: i32) -> (i32, i32, i32) {
    %c0_i32 = arith.constant 0 : i32
    %c0_i32_0 = arith.constant 0 : i32
    %c0_i32_1 = arith.constant 0 : i32
    return %arg0, %c0_i32, %c0_i32_0 : i32, i32, i32
  }
  func.func @transform_2(%arg0: i32, %arg1: i32) -> (i32, i32) {
    %c0_i32 = arith.constant 0 : i32
    %c0_i32_0 = arith.constant 0 : i32
    %c0_i32_1 = arith.constant 0 : i32
    return %c0_i32, %c0_i32_0 : i32, i32
  }
  func.func @transform_3(%arg0: i32, %arg1: i32) -> (i32, i32) {
    %c0_i32 = arith.constant 0 : i32
    %c0_i32_0 = arith.constant 0 : i32
    %c0_i32_1 = arith.constant 0 : i32
    return %c0_i32, %c0_i32_0 : i32, i32
  }
  func.func @transform_4(%arg0: i32, %arg1: i32) -> (i32, i32) {
    %c0_i32 = arith.constant 0 : i32
    %c0_i32_0 = arith.constant 0 : i32
    %c0_i32_1 = arith.constant 0 : i32
    return %c0_i32, %c0_i32_0 : i32, i32
  }
  func.func @transform_5(%arg0: i32, %arg1: i32) -> (i32, i32) {
    %c0_i32 = arith.constant 0 : i32
    %c0_i32_0 = arith.constant 0 : i32
    %c0_i32_1 = arith.constant 0 : i32
    return %c0_i32, %c0_i32_0 : i32, i32
  }
  func.func @transform_6(%arg0: i32, %arg1: i32) -> (i32, i32) {
    %c0_i32 = arith.constant 0 : i32
    %c0_i32_0 = arith.constant 0 : i32
    %c0_i32_1 = arith.constant 0 : i32
    return %c0_i32, %c0_i32_0 : i32, i32
  }
  func.func @transform_7(%arg0: i32, %arg1: i32) -> (i32, i32) {
    %c0_i32 = arith.constant 0 : i32
    %c0_i32_0 = arith.constant 0 : i32
    %c0_i32_1 = arith.constant 0 : i32
    return %c0_i32, %c0_i32_0 : i32, i32
  }
  func.func @transform_8(%arg0: i32, %arg1: i32) -> (i32, i32) {
    %c0_i32 = arith.constant 0 : i32
    %c0_i32_0 = arith.constant 0 : i32
    %c0_i32_1 = arith.constant 0 : i32
    return %c0_i32, %c0_i32_0 : i32, i32
  }
  func.func @transform_9(%arg0: i32, %arg1: i32) -> (i32, i32, i32, i32) {
    %c0_i32 = arith.constant 0 : i32
    %c0_i32_0 = arith.constant 0 : i32
    %c0_i32_1 = arith.constant 0 : i32
    return %arg0, %c0_i32, %arg1, %c0_i32_0 : i32, i32, i32, i32
  }
}

</mosaic_0001>

<bundles_post_ra>
// kernel: tpu_custom_call.1
= control target key start
LH: loop header
LB: loop body
LE: loop exit
PB: predicated region body
PF: predicated region fallthrough
CT: control target
= control target key end

     0   :  { %14 = vsyncpa [#allocation7], 0  ;;  %s1498_s0 = inlined_call_operand.hbm [shape: f32[2,8,32], index: 0, kind: input, shape index: {}]   ;;  %s1499_s1 = inlined_call_operand.vmem [shape: f32[2,1,8], index: 1, kind: input, shape index: {}]   ;;  %s1500_s2 = inlined_call_operand.vmem [shape: f32[32,32], index: 2, kind: input, shape index: {}]   ;;  %s1501_s3 = inlined_call_operand.vmem [shape: f32[1,32], index: 3, kind: input, shape index: {}]   ;;  %s1502_s4 = inlined_call_operand.vmem [shape: f32[1,16], index: 4, kind: input, shape index: {}]   ;;  %s1503_s5 = inlined_call_operand.vmem [shape: f32[4,32], index: 5, kind: input, shape index: {}]   ;;  %s1504_s6 = inlined_call_operand.vmem [shape: f32[4,1], index: 6, kind: input, shape index: {}]   ;;  %s1505_s7 = inlined_call_operand.vmem [shape: f32[32,4], index: 7, kind: input, shape index: {}]   ;;  %s1506_s8 = inlined_call_operand.vmem [shape: f32[1,4], index: 8, kind: input, shape index: {}]   ;;  %s1507_s9 = inlined_call_operand.hbm [shape: f32[2,4,8,8], index: 9, kind: output, shape index: {}]  }
   0x1   :  { %16 = vsyncpa [#allocation7 + $0x1], 0 }
   0x2   :  { %17 = vsyncpa [#allocation8], 0 }
   0x3   :  { %19 = vsyncpa [#allocation8 + $0x1], 0  ;;  %s1272_s30 = smov 0   ;;  %s1274_s10 = smov 0  }
   0x4   :  { %s1276_s11 = smov 0   ;;  %s1278_s12 = smov 0  }
   0x5   :  { %s1280_s13 = smov 0   ;;  %s1282_s14 = smov 0  }
   0x6 LB: > { %s944_s15 = sadd.s32 4294967295, %s1208_s14   ;;  %s945_s16 = sadd.s32 4294967294, %s1208_s14   ;;  %s1208_s14 = sphi %s1282_s14, %s25_s14   ;;  %s1204_s13 = sphi %s1280_s13, %s1524_s13   ;;  %s1200_s12 = sphi %s1278_s12, %s1523_s12   ;;  %s1196_s11 = sphi %s1276_s11, %s1522_s11   ;;  %s1192_s10 = sphi %s1274_s10, %s1521_s10   ;;  %s1188_s30 = sphi %s1272_s30, %s1520_s30  }
   0x7   : > { %s37_s17 = sadd.s32 1, %s1204_s13  ;;  %s44_s18 = sadd.s32 1, %s1196_s11 }
   0x8   : > { %p39_p0 = scmp.ge.s32.totalorder %s37_s17, 2  ;;  %p51_p1 = scmp.ne.s32.totalorder %s1196_s11, %s1192_s10 }
   0x9   : > { %p52_p2 = scmp.eq.s32.totalorder %s1208_s14, 0  ;;  %p57_p3 = scmp.ne.s32.totalorder %s1192_s10, %s1188_s30 }
   0xa   : > { %s1526_s17 = smov (%p39_p0, %s37_s17), 0  ;;  %p58_p5 = scmp.eq.s32.totalorder %s944_s15, 0 }
   0xb   : > { %1509 = sst [smem:[#allocation12_spill]] %s1526_s17  ;;  %p1313_p4 = por %p52_p2, %p51_p1 }
   0xc   : > { %s41_s20 = ssub.s32 %s1204_s13, %s1526_s17  ;;  %p256_p6 = scmp.eq.s32.totalorder %s944_s15, 1 }
   0xd   : > { %p42_p7 = scmp.eq.s32.totalorder %s41_s20, 0  ;;  %p1319_p8 = por %p58_p5, %p57_p3 }
   0xe   : > { %p1323_p9 = por %p256_p6, %p51_p1  ;;  %p262_p10 = scmp.eq.s32.totalorder %s945_s16, 1 }
   0xf   : > { %s1328_s23 = scalar_select %p42_p7, %s1196_s11, %s44_s18  }
  0x10   : > { %p1330_p11 = por %p262_p10, %p57_p3  ;;  %p1035_p13 = scmp.lt.s32.totalorder %s1208_s14, 2 }
  0x11   : > { %1513 = sst [smem:[#allocation13_spill]] %s1328_s23  ;;  %s303_s25 = sand.u32 1, %s1196_s11  }
  0x12   : > { %s1514_s24 = scalar_select %p1330_p11, 1, 0 }
  0x13   : > { %s948_s26 = sshll.u32 %s303_s25, 3  ;;  %s949_s27 = sshll.u32 %s1204_s13, 7 }
  0x14   : > { %s312_s15 = scalar_lea.hbm %s1498_s0, %s949_s27  ;;  %s307_s20 = scalar_lea.vmem [#allocation6], %s948_s26 }
  0x15   : > { %s314_s17 = sshll.u32 %s307_s20, 4  ;;  %p1343_p0 = pnand %p1035_p13, %p1313_p4  ;;  %s315_s17 = int_to_ptr.vmem [resolvable:$true] %s314_s17 }
  0x16   : > { %p950_p1 = scmp.ge.s32.totalorder %s1208_s14, 1  ;;  %p325_p2 = scmp.lt.s32.totalorder %s1208_s14, 3 }
  0x17   : > { %s304_s18 = scalar_lea.sflag [#allocation7], %s303_s25  ;;  %p1102_p3 = pneg %p1343_p0 }
  0x18   : > { %s1113_s23 = scalar_lea.vmem %s315_s17, 128  ;;  %s1210_s28 = smov [#allocation6]  }
  0x19   : > { %p1114_p5 = scmp.ne.s32.totalorder %s315_s17, %s1113_s23  ;;  %s1118_s27 = sshll.u32 %s1210_s28, 4  ;;  %s1119_s27 = int_to_ptr.vmem [resolvable:$false] %s1118_s27 }
  0x1a   : > { %s1120_s26 = scalar_lea.vmem %s1119_s27, 256  ;;  %p1121_p10 = scmp.lt.s32.totalorder %s315_s17, %s1119_s27 }
  0x1b   : > { %p1116_p6 = pnand %p1114_p5, %p1102_p3  ;;  %p1122_p12 = scmp.lt.s32.totalorder %s1120_s26, %s1113_s23 }
  0x1d   : > { %p1117_p7 = pneg %p1116_p6  ;;  %p1123_p4 = por %p1122_p12, %p1121_p10 }
  0x1f   : > { %p1124_p13 = pnand %p1123_p4, %p1117_p7 }
  0x21   : > { %1127 = shalt.err (!%p1124_p13)
}
  0x22   : > { %1030 = dma.hbm_to_vmem [thread:$0]  (!%p1343_p0), %s312_s15, 128, %s315_s17, %s304_s18  }
  0x23   : > { %p326_p11 = pnand %p950_p1, %p325_p2 }
  0x24   : > { %s1358_s19 = sand.u32 (!%p326_p11), 1, %s1192_s10  }
  0x25   : > { %329 = sbr.rel (%p326_p11) target bundleno = 717 (0x2cd), region = 56  ;;  %s951_s25 = sshll.u32 (!%p326_p11), %s1358_s19, 3 }
  0x26   : > { %s332_s23 = scalar_lea.sflag (!%p326_p11), [#allocation7], %s1358_s19  ;;  %s335_s29 = scalar_lea.vmem (!%p326_p11), [#allocation6], %s951_s25 }
  0x2a   : > { %1179 = dma.done.wait (%p1319_p8), %s332_s23, 128  }
  0x2b   : > { %1181 = vsyncadd (%p1319_p8), %s332_s23, 4294967168  ;;  %v1211_v0 = vmov 0.0   ;;  %vm1212_vm0 = vmmov 0   ;;  %v384_v1 = vld [vmem:[%s1500_s2 + $0x18] sm:$0xff]  ;;  %v383_v2 = vld [vmem:[%s1500_s2 + $0x10] sm:$0xff]  ;;  %vm392_vm1 = vcmask 261120   ;;  %v689_v37 = vlaneseq }
  0x2c   : > { %989 = vmatprep.subr.mxu0 %v1211_v0  ;;  %997 = vmatprep.mubr.msk.f32.mxu0 %vm1212_vm0, %v1211_v0  ;;  %v382_v3 = vld [vmem:[%s1500_s2 + $0x8] sm:$0xff]  ;;  %v381_v4 = vld [vmem:[%s1500_s2] sm:$0xff]  ;;  %v1213_v7 = vmov 0   ;;  %vm474_vm2 = vcmask 130048   ;;  %s1214_s20 = smov 112   ;;  %v602_v15 = vld [vmem:[%s1505_s7 + $0x18] sm:$0xff] }
  0x2d   : > { %1000 = vmatprep.subr.mxu1 %v1211_v0  ;;  %1002 = vmatprep.mubr.msk.f32.mxu1 %vm1212_vm0, %v1211_v0  ;;  %v380_v5 = vld [vmem:[%s335_s29] sm:$0xff]  ;;  %v516_v6 = vld [vmem:[%s1504_s6] sm:$0xf]  ;;  %v1215_v20 = vmov 3   ;;  %vm597_vm3 = vcmask 60416   ;;  %vm680_vm4 = vcmask 31744  }
  0x2e   : > { %990 = vmatpush3.msra.mxu0 %v384_v1  ;;  %1095 = vset.pattern.permute.xlu1 %v1213_v7  ;;  %v953_v8 = vld [vmem:[%s1501_s3] ss:$0 sm:$0xff]  ;;  %v601_v16 = vld [vmem:[%s1505_s7 + $0x10] sm:$0xff]  ;;  %v600_v17 = vld [vmem:[%s1505_s7 + $0x8] sm:$0xff]  ;;  %v1216_v30 = vmov 1   ;;  %v1217_v31 = vmov 2  }
  0x2f   : > { %991 = vmatprep.subr.mxu0 %v1211_v0  ;;  %519 = vperm.xlu1 %1095, %v516_v6   ;;  %v955_v10 = vld [vmem:[%s1502_s4] ss:$0 sm:$0xff]  ;;  %vm512_vm5 = vcmask 64512   ;;  %p373_p8 = scmp.lt.s32.totalorder %s1200_s12, 1  ;;  %v690_v39 = vshrl.u32 %v689_v37, 7  ;;  %v694_v44 = vand.u32 127, %v689_v37 }
  0x30   : > { %992 = vmatpush3.msra.mxu0 %v383_v2  ;;  %v515_v14 = vld [vmem:[%s1503_s5] sm:$0xf]  ;;  %s952_s27 = sshll.u32 %s1358_s19, 5  ;;  %v1218_v47 = vmov -1e+12   ;;  %s973_s26 = sshll.u32 %s1200_s12, 9 }
  0x31   : > { %993 = vmatprep.subr.mxu0 %v1211_v0  ;;  %v599_v18 = vld [vmem:[%s1505_s7] sm:$0xff]  ;;  %s374_s16 = scalar_select %p373_p8, %s1200_s12, 1  ;;  %v701_v40 = vsub.s32 0, %v690_v39  ;;  %vm695_vm8 = vcmp.gt.s32.totalorder %v694_v44, %v690_v39 }
  0x32   : > { %994 = vmatpush3.msra.mxu0 %v382_v3  ;;  %v958_v25 = vld [vmem:[%s1506_s8] ss:$0 sm:$0xff]  ;;  %s372_s25 = scalar_lea.vmem [#allocation9], %s952_s27  ;;  %s1444_s15 = scalar_lea.hbm %s1507_s9, %s973_s26 }
  0x33   : > { %995 = vmatprep.subr.mxu0 %v1211_v0  ;;  %s375_s28 = scalar_lea.vmem %s1499_s1, %s374_s16  ;;  %s848_s23 = sshll.u32 %s372_s25, 4  ;;  %s1446_s23 = int_to_ptr.vmem [resolvable:$true] %s848_s23 }
  0x34   : > { %996 = vmatpush3.msra.mxu0 %v381_v4  ;;  %v696_v38 = vld [vmem:[%s375_s28] sm:$0x1]  ;;  %s834_s12 = scalar_lea.sflag [#allocation8], %s1358_s19  ;;  %s1219_s16 = smov [#allocation9]  }
  0x35   : > { %998 = vmatmul.mubr.msk.f32.vlgmr.msra.gmra.mxu0 %vm392_vm1, %v380_v5  ;;  %1016 = vmatprep.subr.mxu0 %v1211_v0  ;;  %vm697_vm6 = vcmp.gt.f32.partialorder %v696_v38, 0.0  ;;  %s1132_s21 = sshll.u32 %s1219_s16, 4  ;;  %s1133_s21 = int_to_ptr.vmem [resolvable:$false] %s1132_s21 }
  0x36   : > { %1020 = vmatprep.mubr.msk.f32.mxu0 %vm1212_vm0, %v1211_v0  ;;  %v698_v42 = vsel %vm697_vm6, 1, %v1213_v7  ;;  %s1134_s18 = scalar_lea.vmem %s1133_s21, 1024  ;;  %p1135_p1 = scmp.lt.s32.totalorder %s1446_s23, %s1133_s21 }
  0x37   : > { %v702_v43 = vrot.slane %v698_v42, %v701_v40 }
  0x39   : > { %vm703_vm7 = vcmp.eq.s32.totalorder %v702_v43, 1 }
  0x3a   : > { %vm704_vm9 = vmand %vm695_vm8, %vm703_vm7 }
  0x3b   : > { %v705_v48 = vsel %vm704_vm9, 0.0, %v1218_v47 }
  0xaa   : > { %v520_v21 = vpop.permute.xlu1 %519 }
  0xf5   : > { %v462_v9 = vpop.f32.mrf.mxu0 }
  0xf6   : > { %v463_v11 = vadd.f32 %v953_v8, %v462_v9 }
  0xf7   : > { %v999_v12 = vpop.f32.mrf.mxu0 }
  0xf8   : > { %v473_v13 = vmul.f32 %v955_v10, %v463_v11  ;;  %477 = vrot.lane.b32.xlu0 %v463_v11, %s1214_s20  ;;  %1001 = vmatpush3.xpose.msk.msra.mxu1 %vm392_vm1, %v463_v11  ;;  %s1128_s20 = scalar_lea.vmem %s1446_s23, 512 }
  0xf9   : > { %1005 = vmatprep.subr.mxu1 %v1211_v0  ;;  %p1129_p11 = scmp.ne.s32.totalorder %s1446_s23, %s1128_s20  ;;  %p1136_p2 = scmp.lt.s32.totalorder %s1134_s18, %s1128_s20 }
  0xfa   : > { %475 = vst.msk [vmem:[#allocation2] sm:$0xff] %vm474_vm2, %v473_v13 }
  0xfb   : > { %1003 = vmatmul.mubr.msk.f32.vlgmr.msra.gmra.mxu1 %vm392_vm1, %v515_v14  ;;  %p1130_p12 = pnand %p1129_p11, %p1323_p9  ;;  %p1137_p3 = por %p1136_p2, %p1135_p1 }
  0xfc   : > { %1006 = vmatpush3.msra.mxu1 %v602_v15  ;;  %1013 = vmatprep.mubr.msk.f32.mxu1 %vm1212_vm0, %v1211_v0 }
  0xfd   : > { %1007 = vmatprep.subr.mxu1 %v1211_v0  ;;  %p1131_p0 = pneg %p1130_p12 }
  0xfe   : > { %1008 = vmatpush3.msra.mxu1 %v601_v16 }
  0xff   : > { %1009 = vmatprep.subr.mxu1 %v1211_v0  ;;  %p1138_p5 = pnand %p1137_p3, %p1131_p0 }
 0x100   : > { %1010 = vmatpush3.msra.mxu1 %v600_v17 }
 0x101   : > { %1011 = vmatprep.subr.mxu1 %v1211_v0  ;;  %v684_v36 = vld [vmem:[#allocation2] sm:$0xff] }
 0x102   : > { %1012 = vmatpush3.msra.mxu1 %v599_v18 }
 0x103   : > { %1014 = vmatmul.mubr.msk.f32.vlgmr.msra.gmra.mxu1 %vm392_vm1, %v463_v11 }
 0x16a   : > { %v478_v19 = vpop.permute.xlu0 %477 }
 0x16b   : > { %480 = vxpose.xlu0.b32.start.end [1/1] (short) (narrow) %v478_v19, 16 }
 0x194   : > { %1099 = vset.pattern.permute.xlu0 %v1215_v20 }
 0x1bb   : > { %v593_v22 = vpop.f32.mrf.mxu1 }
 0x1bc   : > { %v594_v23 = vadd.f32 %v593_v22, %v520_v21 }
 0x1bd   : > { %v1004_v24 = vpop.f32.mrf.mxu1 }
 0x1be   : > { %598 = vst.msk [vmem:[#allocation4] sm:$0xf] %vm597_vm3, %v594_v23 }
 0x1c3   : > { %v676_v26 = vpop.f32.mrf.mxu1 }
 0x1c4   : > { %v677_v27 = vadd.f32 %v958_v25, %v676_v26 }
 0x1c5   : > { %v1015_v28 = vpop.f32.mrf.mxu1  ;;  %v961_v54 = vld [vmem:[#allocation4] ss:$0 sm:$0xff]  ;;  %v962_v58 = vld [vmem:[#allocation4 + $0x1] ss:$0 sm:$0xff]  ;;  %v964_v59 = vld [vmem:[#allocation4 + $0x2] ss:$0 sm:$0xff] }
 0x1c6   : > { %681 = vst.msk [vmem:[#allocation5] sm:$0xff] %vm680_vm4, %v677_v27  ;;  %v966_v60 = vld [vmem:[#allocation4 + $0x3] ss:$0 sm:$0xff] }
 0x1cd   : > { %v688_v29 = vld [vmem:[#allocation5] sm:$0xff] }
 0x1ce   : > { %782 = vperm.xlu1 %1095, %v688_v29  }
 0x1d2   : > { %1096 = vset.pattern.permute.xlu1 %v1216_v30 }
 0x1d3   : > { %795 = vperm.xlu1 %1096, %v688_v29  }
 0x1d7   : > { %1097 = vset.pattern.permute.xlu1 %v1217_v31 }
 0x1d8   : > { %808 = vperm.xlu1 %1097, %v688_v29  }
 0x1dc   : > { %1098 = vset.pattern.permute.xlu1 %v1215_v20 }
 0x1dd   : > { %821 = vperm.xlu1 %1098, %v688_v29  }
 0x1e7   : > { %v496_v32 = vpop.trf.xlu0 }
 0x1e8   : > { %513 = vst.msk [vmem:[#allocation3] sm:$0xff] %vm512_vm5, %v496_v32 }
 0x1eb   : > { %v497_v33 = vpop.trf.xlu0 }
 0x1ec   : > { %514 = vst.msk [vmem:[#allocation3 + $0x8] sm:$0xff] %vm512_vm5, %v497_v33 }
 0x1ef   : > { %v685_v35 = vld [vmem:[#allocation3] sm:$0xff] }
 0x1f3   : > { %v686_v34 = vld [vmem:[#allocation3 + $0x8] sm:$0xff] }
 0x1f4   : > { %1017 = vmatpush3.msra.mxu0 %v686_v34 }
 0x1f5   : > { %1018 = vmatprep.subr.mxu0 %v1211_v0 }
 0x1f6   : > { %1019 = vmatpush3.msra.mxu0 %v685_v35 }
 0x1f7   : > { %1021 = vmatmul.mubr.msk.f32.vlgmr.msra.gmra.mxu0 %vm474_vm2, %v684_v36 }
 0x249   : > { %v783_v41 = vpop.permute.xlu1 %782 }
 0x24e   : > { %v796_v45 = vpop.permute.xlu1 %795 }
 0x253   : > { %v809_v46 = vpop.permute.xlu1 %808 }
 0x258   : > { %v822_v51 = vpop.permute.xlu1 %821 }
 0x2b7   : > { %v776_v49 = vpop.f32.mrf.mxu0 }
 0x2b8   : > { %v777_v50 = vadd.f32 %v776_v49, %v705_v48 }
 0x2b9   : > { %v1022_v52 = vpop.f32.mrf.mxu0 }
 0x2ba   : > { %v785_v53 = vadd.f32 %v783_v41, %v777_v50  ;;  %v798_v55 = vadd.f32 %v796_v45, %v777_v50  ;;  %v811_v56 = vadd.f32 %v809_v46, %v777_v50  ;;  %v824_v57 = vadd.f32 %v822_v51, %v777_v50 }
 0x2bc   : > { %v791_v61 = vadd.f32 %v961_v54, %v785_v53  ;;  %v804_v62 = vadd.f32 %v962_v58, %v798_v55  ;;  %v817_v63 = vadd.f32 %v964_v59, %v811_v56  ;;  %v830_v0 = vadd.f32 %v966_v60, %v824_v57 }
 0x2be   : > { %793 = vst.msk [vmem:[%s372_s25] sm:$0xff] %vm512_vm5, %v791_v61  ;;  %963 = vst.msk [vmem:[%s372_s25 + $0x8] sm:$0xff] %vm512_vm5, %v804_v62 }
 0x2bf   : > { %965 = vst.msk [vmem:[%s372_s25 + $0x10] sm:$0xff] %vm512_vm5, %v817_v63  ;;  %967 = vst.msk [vmem:[%s372_s25 + $0x18] sm:$0xff] %vm512_vm5, %v830_v0 }
 0x2c0   : > { %1141 = shalt.err (!%p1138_p5)
}
 0x2c1   : > { %s1142_s28 = scalar_lea.hbm %s1444_s15, 512  ;;  %s1146_s25 = scalar_lea.hbm %s1507_s9, 1024 }
 0x2c2   : > { %p1143_p6 = scmp.ne.s32.totalorder %s1444_s15, %s1142_s28  ;;  %p1147_p4 = scmp.lt.s32.totalorder %s1444_s15, %s1507_s9 }
 0x2c3   : > { %p1148_p13 = scmp.lt.s32.totalorder %s1146_s25, %s1142_s28 }
 0x2c4   : > { %p1144_p7 = pnand %p1143_p6, %p1323_p9 }
 0x2c5   : > { %p1149_p8 = por %p1148_p13, %p1147_p4 }
 0x2c6   : > { %p1145_p10 = pneg %p1144_p7 }
 0x2c8   : > { %p1150_p11 = pnand %p1149_p8, %p1145_p10 }
 0x2ca   : > { %1153 = shalt.err (!%p1150_p11)
}
 0x2cb   : > { %s1220_s20 = smov 128   ;;  %s1221_s16 = smov 8  }
 0x2cc   : > { %1025 = dma.vmem_to_hbm [thread:$0]  (%p1323_p9), %s1446_s23, 512, %s1444_s15, %s834_s12, %s1220_s20, %s1220_s20, %s1221_s16  }
 0x2cd PF: > { %s863_s21 = sand.u32 1, %s1188_s30   ;;  %p1516_p12 = scmp.ne.s32.totalorder %s1514_s24, 0 }
 0x2ce   : > { %p1517_p0 = scmp.ge.s32.totalorder %s1208_s14, 2  ;;  %s864_s18 = scalar_lea.sflag [#allocation8], %s863_s21 }
 0x2d0   : > { %p1032_p1 = pnand %p1517_p0, %p1516_p12 }
 0x2d2   : > { %p1033_p2 = pneg %p1032_p1 }
 0x2d4   : > { %1183 = dma.done.wait (%p1033_p2), %s864_s18, 512  }
 0x2d5   : > { %1185 = vsyncadd (%p1033_p2), %s864_s18, 4294966784  ;;  %s25_s14 = sadd.s32 1, %s1208_s14   ;;  %s1518_s22 = sld [smem:[#allocation13_spill]] }
 0x2d6   : > { %p22_p3 = scmp.ge.s32.totalorder %s25_s14, 4   ;;  %s1519_s19 = sld [smem:[#allocation12_spill]] }
 0x2d7   : > { %s1520_s30 = smov %s1192_s10  ;;  %s1521_s10 = smov %s1196_s11 }
 0x2d8   : > { %s1523_s12 = smov %s1204_s13  ;;  %24 = sbr.rel (!%p22_p3) target bundleno = 6 (0x6), region = 113 }
 0x2db   : > { %s1522_s11 = smov %s1518_s22 }
 0x2dc   : > { %s1524_s13 = smov %s1519_s19 }
 0x2dd   :  { %869 = vsyncpa [#allocation7], 1 }
 0x2de   :  { %871 = vsyncpa [#allocation7 + $0x1], 1 }
 0x2df   :  { %872 = vsyncpa [#allocation8], 1 }
 0x2e0   :  { %874 = vsyncpa [#allocation8 + $0x1], 1 }

</bundles_post_ra>
